<compile_context>
chip_gen: v5e
topology: v5e:2x2
jax: 0.10.0
libtpu: 0.0.40
codegen_flags: <defaults>
</compile_context>

<pallas_src>
import functools
import math

import jax
import jax.numpy as jnp
from jax.experimental import pallas as pl
from jax.experimental.pallas import tpu as pltpu


def _sep_conv1d_kernel(x_ref, wdw_ref, wpw_ref, bc_ref, o_ref,
                       *, kernel, stride, pad, l_out):
    """One batch tile per grid step.

    x_ref   : (C, TB, L)       raw (unpadded) input tile, channel-major
    wdw_ref : (C, 1, K)        depthwise weights
    wpw_ref : (NO, C)          pointwise weights
    bc_ref  : (NO, 1)          combined bias  W_pw @ b_dw + b_pw
    o_ref   : (NO, TB*L_out)   lane-dense output slab (batch folded into lanes)
    """
    c, tb, _ = x_ref.shape

    x = x_ref[...].astype(jnp.float32)                     # (C, TB, L)
    wdw = wdw_ref[...].astype(jnp.float32)                 # (C, 1, K)

    # Zero padding built in-register (no VMEM scratch round trip, no cross-step
    # scratch state -> safe under v7x megacore grid sharding).
    if pad > 0:
        zeros = jnp.zeros((c, tb, pad), jnp.float32)
        xp = jnp.concatenate([zeros, x, zeros], axis=-1)   # (C, TB, L + 2*pad)
    else:
        xp = x

    # Depthwise conv (groups == C): small static tap loop on the VPU, f32 acc.
    y = jnp.zeros((c, tb, l_out), jnp.float32)
    if stride == 1:
        for t in range(kernel):                            # contiguous tap slices
            y = y + wdw[:, :, t:t + 1] * xp[:, :, t:t + l_out]
    else:
        # Lane-strided tap slices (XLU slot) keep the VALU work at l_out width
        # instead of accumulating at full resolution and decimating.
        span = (l_out - 1) * stride + 1
        for t in range(kernel):
            y = y + wdw[:, :, t:t + 1] * xp[:, :, t:t + span:stride]

    # Pointwise 1x1 conv == one wide, lane-dense channel-mixing matmul on the
    # MXU (batch tile folded into the lane axis), then the folded bias.
    y2 = y.reshape(c, tb * l_out)                          # (C, TB*L_out)
    z = jnp.dot(wpw_ref[...].astype(jnp.float32), y2,
                preferred_element_type=jnp.float32)        # (NO, TB*L_out)
    z = z + bc_ref[...].astype(jnp.float32)
    o_ref[...] = z.astype(o_ref.dtype)


def _choose_batch_tile(n, c, no, length, l_out, pad):
    """Pick the batch tile from the real per-step VMEM footprint."""
    # bytes of VMEM touched per batch sample per grid step (f32 everywhere)
    coeff = 4 * (2 * c * length              # double-buffered input block
                 + 2 * no * l_out            # double-buffered output block
                 + c * (length + 2 * pad)    # in-register padded input
                 + 2 * c * l_out             # depthwise result + matmul-RHS copy
                 + no * l_out)               # matmul result
    budget = 20 << 20                        # conservative across v5e/v6e/v7x
    tb_vmem = max(1, budget // max(coeff, 1))

    # Alignment required when the batch axis is actually tiled:
    #   input block  (C, tb, L)       -> tb % 8 == 0
    #   output block (NO, tb*l_out)   -> (tb*l_out) % 128 == 0
    align = math.lcm(8, 128 // math.gcd(l_out, 128))

    # Keep >= 2 grid steps so both v7x TensorCores get work.
    tb_cap = max(1, min(tb_vmem, -(-n // 2)))

    if n <= align or tb_cap < align:
        # Single tile: block dims equal the full array dims, no alignment needed.
        # TODO(synk): if n*coeff ever exceeds the VMEM budget here (tiny, odd
        # l_out together with huge C*L), add an L-tile grid axis with a
        # (kernel-1) halo instead of growing the batch tile.
        return n, n, 1

    tb_unit = (tb_cap // align) * align
    n_tiles = max(2, -(-n // tb_unit))
    per_tile = -(-n // n_tiles)
    tb = (-(-per_tile // align)) * align
    n_pad = n_tiles * tb
    return tb, n_pad, n_tiles


def sep_conv1d(x, w_dw, b_dw, w_pw, b_pw, *, kernel, stride, pad):
    """Pallas separable conv1d.

    x:    (N, C, L)  float32
    w_dw: (C, kernel), b_dw: (C,)
    w_pw: (NO, C),     b_pw: (NO,)
    returns (N, NO, L_out)
    """
    n, c, length = x.shape
    no = w_pw.shape[0]
    l_out = (length + 2 * pad - kernel) // stride + 1

    tb, n_pad, n_tiles = _choose_batch_tile(n, c, no, length, l_out, pad)

    # Channel-major layout (C, N, L): full sublane use for C < 8 and a
    # reshape-free batch fold for the matmul RHS.  Done once in XLA.
    xt = jnp.transpose(x, (1, 0, 2)).astype(jnp.float32)
    if n_pad != n:
        xt = jnp.pad(xt, ((0, 0), (0, n_pad - n), (0, 0)))

    # Fold the depthwise bias through the pointwise conv (host-side, once).
    b_comb = (w_pw.astype(jnp.float32) @ b_dw.astype(jnp.float32)
              + b_pw.astype(jnp.float32)).reshape(no, 1)
    w_dw3 = w_dw.astype(jnp.float32).reshape(c, 1, kernel)

    kern = functools.partial(_sep_conv1d_kernel, kernel=kernel, stride=stride,
                             pad=pad, l_out=l_out)

    out_flat = pl.pallas_call(
        kern,
        out_shape=jax.ShapeDtypeStruct((no, n_pad * l_out), jnp.float32),
        grid_spec=pltpu.PrefetchScalarGridSpec(
            num_scalar_prefetch=0,
            grid=(n_tiles,),
            in_specs=[
                pl.BlockSpec((c, tb, length), lambda i: (0, i, 0)),
                pl.BlockSpec((c, 1, kernel), lambda i: (0, 0, 0)),
                pl.BlockSpec((no, c), lambda i: (0, 0)),
                pl.BlockSpec((no, 1), lambda i: (0, 0)),
            ],
            out_specs=pl.BlockSpec((no, tb * l_out), lambda i: (0, i)),
        ),
        compiler_params=pltpu.CompilerParams(
            dimension_semantics=("parallel",),
            vmem_limit_bytes=32 * 1024 * 1024),
    )(xt, w_dw3, w_pw, b_comb)

    # (NO, N*L_out) -> (N, NO, L_out): cheap layout plumbing on the small output.
    # TODO(synk): when l_out is a multiple of 128, write the natural
    # (N, NO, L_out) layout directly from the kernel and drop this transpose.
    out = out_flat.reshape(no, n_pad, l_out).transpose(1, 0, 2)
    return out[:n]


def _reference(x, w_dw, b_dw, w_pw, b_pw, *, kernel, stride, pad):
    """Pure-JAX reference using lax.conv_general_dilated (matches PyTorch Conv1d)."""
    c = x.shape[1]
    no = w_pw.shape[0]
    y = jax.lax.conv_general_dilated(
        x, w_dw.reshape(c, 1, kernel),
        window_strides=(stride,), padding=[(pad, pad)],
        dimension_numbers=("NCH", "OIH", "NCH"),
        feature_group_count=c)
    y = y + b_dw.reshape(1, c, 1)
    z = jax.lax.conv_general_dilated(
        y, w_pw.reshape(no, c, 1),
        window_strides=(1,), padding=[(0, 0)],
        dimension_numbers=("NCH", "OIH", "NCH"))
    return z + b_pw.reshape(1, no, 1)


if __name__ == "__main__":
    # _SepConv1d(ni=4, no=8, kernel=3, stride=1, pad=1)
    N, NI, NO, L = 2, 4, 8, 16
    KERNEL, STRIDE, PAD = 3, 1, 1

    key = jax.random.PRNGKey(0)
    kx, k1, k2, k3, k4 = jax.random.split(key, 5)

    x = jax.random.normal(kx, (N, NI, L), dtype=jnp.float32)
    w_dw = jax.random.normal(k1, (NI, KERNEL), dtype=jnp.float32) * 0.1
    b_dw = jax.random.normal(k2, (NI,), dtype=jnp.float32) * 0.1
    w_pw = jax.random.normal(k3, (NO, NI), dtype=jnp.float32) * 0.1
    b_pw = jax.random.normal(k4, (NO,), dtype=jnp.float32) * 0.1

    out = sep_conv1d(x, w_dw, b_dw, w_pw, b_pw,
                     kernel=KERNEL, stride=STRIDE, pad=PAD)
    out = jax.block_until_ready(out)

    ref = _reference(x, w_dw, b_dw, w_pw, b_pw,
                     kernel=KERNEL, stride=STRIDE, pad=PAD)
    assert out.shape == ref.shape == (N, NO, L)
    assert jnp.allclose(out, ref, atol=1e-5, rtol=1e-5), "mismatch vs reference"

    print("KERNEL_OK")
</pallas_src>

<mosaic_0001>
module attributes {stable_mosaic.version = 11 : i64} {
  func.func @_sep_conv1d_kernel(%arg0: i32, %arg1: memref<4x2x16xf32, #tpu.memory_space<vmem>>, %arg2: memref<4x1x3xf32, #tpu.memory_space<vmem>>, %arg3: memref<8x4xf32, #tpu.memory_space<vmem>>, %arg4: memref<8x1xf32, #tpu.memory_space<vmem>>, %arg5: memref<8x32xf32, #tpu.memory_space<vmem>>) attributes {dimension_semantics = [#tpu.dimension_semantics<parallel>], iteration_bounds = array<i64: 1>, scalar_prefetch = 0 : i64, scratch_operands = 0 : i64, tpu.core_type = #tpu.core_type<tc>, window_params = [{transform_indices = @transform_0, window_bounds = array<i64: 4, 2, 16>}, {pipeline_mode = #tpu.pipeline_mode<synchronous>, transform_indices = @transform_1, window_bounds = array<i64: 4, 1, 3>}, {pipeline_mode = #tpu.pipeline_mode<synchronous>, transform_indices = @transform_2, window_bounds = array<i64: 8, 4>}, {pipeline_mode = #tpu.pipeline_mode<synchronous>, transform_indices = @transform_3, window_bounds = array<i64: 8, 1>}, {transform_indices = @transform_4, window_bounds = array<i64: 8, 32>}]} {
    %c0 = arith.constant 0 : index
    %c0_0 = arith.constant 0 : index
    %c0_1 = arith.constant 0 : index
    %0 = vector.load %arg1[%c0, %c0_0, %c0_1] : memref<4x2x16xf32, #tpu.memory_space<vmem>>, vector<4x2x16xf32>
    %c0_2 = arith.constant 0 : index
    %c0_3 = arith.constant 0 : index
    %c0_4 = arith.constant 0 : index
    %1 = vector.load %arg2[%c0_2, %c0_3, %c0_4] : memref<4x1x3xf32, #tpu.memory_space<vmem>>, vector<4x1x3xf32>
    %cst = arith.constant 0.000000e+00 : f32
    %2 = vector.broadcast %cst : f32 to vector<4x2x1xf32>
    %3 = tpu.concatenate %2, %0, %2 in 2 : vector<4x2x1xf32>, vector<4x2x16xf32>, vector<4x2x1xf32> -> vector<4x2x18xf32>
    %cst_5 = arith.constant 0.000000e+00 : f32
    %4 = vector.broadcast %cst_5 : f32 to vector<4x2x16xf32>
    %5 = vector.extract_strided_slice %1 {offsets = [0, 0, 0], sizes = [4, 1, 1], strides = [1, 1, 1]} : vector<4x1x3xf32> to vector<4x1x1xf32>
    %6 = vector.extract_strided_slice %3 {offsets = [0, 0, 0], sizes = [4, 2, 16], strides = [1, 1, 1]} : vector<4x2x18xf32> to vector<4x2x16xf32>
    %7 = vector.broadcast %5 : vector<4x1x1xf32> to vector<4x2x16xf32>
    %8 = arith.mulf %7, %6 : vector<4x2x16xf32>
    %9 = arith.addf %4, %8 : vector<4x2x16xf32>
    %10 = vector.extract_strided_slice %1 {offsets = [0, 0, 1], sizes = [4, 1, 1], strides = [1, 1, 1]} : vector<4x1x3xf32> to vector<4x1x1xf32>
    %11 = vector.extract_strided_slice %3 {offsets = [0, 0, 1], sizes = [4, 2, 16], strides = [1, 1, 1]} : vector<4x2x18xf32> to vector<4x2x16xf32>
    %12 = vector.broadcast %10 : vector<4x1x1xf32> to vector<4x2x16xf32>
    %13 = arith.mulf %12, %11 : vector<4x2x16xf32>
    %14 = arith.addf %9, %13 : vector<4x2x16xf32>
    %15 = vector.extract_strided_slice %1 {offsets = [0, 0, 2], sizes = [4, 1, 1], strides = [1, 1, 1]} : vector<4x1x3xf32> to vector<4x1x1xf32>
    %16 = vector.extract_strided_slice %3 {offsets = [0, 0, 2], sizes = [4, 2, 16], strides = [1, 1, 1]} : vector<4x2x18xf32> to vector<4x2x16xf32>
    %17 = vector.broadcast %15 : vector<4x1x1xf32> to vector<4x2x16xf32>
    %18 = arith.mulf %17, %16 : vector<4x2x16xf32>
    %19 = arith.addf %14, %18 : vector<4x2x16xf32>
    %20 = vector.shape_cast %19 : vector<4x2x16xf32> to vector<4x32xf32>
    %c0_6 = arith.constant 0 : index
    %c0_7 = arith.constant 0 : index
    %21 = vector.load %arg3[%c0_6, %c0_7] : memref<8x4xf32, #tpu.memory_space<vmem>>, vector<8x4xf32>
    %cst_8 = arith.constant dense<0.000000e+00> : vector<8x32xf32>
    %22 = tpu.matmul %21, %20, %cst_8 {dimension_numbers = #tpu.dot_dimension_numbers<[1], [0], [0], [1], [0, 0, 1, 1], [], []>} : vector<8x4xf32>, vector<4x32xf32>, vector<8x32xf32> -> vector<8x32xf32>
    %c0_9 = arith.constant 0 : index
    %c0_10 = arith.constant 0 : index
    %23 = vector.load %arg4[%c0_9, %c0_10] : memref<8x1xf32, #tpu.memory_space<vmem>>, vector<8x1xf32>
    %24 = vector.broadcast %23 : vector<8x1xf32> to vector<8x32xf32>
    %25 = arith.addf %22, %24 : vector<8x32xf32>
    %c0_11 = arith.constant 0 : index
    %c0_12 = arith.constant 0 : index
    %26 = vector.load %arg5[%c0_11, %c0_12] : memref<8x32xf32, #tpu.memory_space<vmem>>, vector<8x32xf32>
    tpu.vector_store %arg5[%c0_11, %c0_12], %25 {strides = array<i32>} : memref<8x32xf32, #tpu.memory_space<vmem>>, vector<8x32xf32>,
    return
  }
  func.func @transform_0(%arg0: i32) -> (i32, i32, i32) {
    %c0_i32 = arith.constant 0 : i32
    %c0_i32_0 = arith.constant 0 : i32
    %c0_i32_1 = arith.constant 0 : i32
    return %c0_i32, %arg0, %c0_i32_0 : i32, i32, i32
  }
  func.func @transform_1(%arg0: i32) -> (i32, i32, i32) {
    %c0_i32 = arith.constant 0 : i32
    %c0_i32_0 = arith.constant 0 : i32
    %c0_i32_1 = arith.constant 0 : i32
    %c0_i32_2 = arith.constant 0 : i32
    return %c0_i32, %c0_i32_0, %c0_i32_1 : i32, i32, i32
  }
  func.func @transform_2(%arg0: i32) -> (i32, i32) {
    %c0_i32 = arith.constant 0 : i32
    %c0_i32_0 = arith.constant 0 : i32
    %c0_i32_1 = arith.constant 0 : i32
    return %c0_i32, %c0_i32_0 : i32, i32
  }
  func.func @transform_3(%arg0: i32) -> (i32, i32) {
    %c0_i32 = arith.constant 0 : i32
    %c0_i32_0 = arith.constant 0 : i32
    %c0_i32_1 = arith.constant 0 : i32
    return %c0_i32, %c0_i32_0 : i32, i32
  }
  func.func @transform_4(%arg0: i32) -> (i32, i32) {
    %c0_i32 = arith.constant 0 : i32
    %c0_i32_0 = arith.constant 0 : i32
    return %c0_i32, %arg0 : i32, i32
  }
}

</mosaic_0001>

<bundles_post_ra>
// kernel: tpu_custom_call.1
= control target key start
LH: loop header
LB: loop body
LE: loop exit
PB: predicated region body
PF: predicated region fallthrough
CT: control target
= control target key end

     0   :  { %s295_s19 = smov 1   ;;  %v296_v3 = vmov 1   ;;  %s375_s0 = inlined_call_operand.vmem [shape: f32[4,2,16], index: 0, kind: input, shape index: {}]   ;;  %s376_s1 = inlined_call_operand.vmem [shape: f32[4,1,3], index: 1, kind: input, shape index: {}]   ;;  %s377_s2 = inlined_call_operand.vmem [shape: f32[8,4], index: 2, kind: input, shape index: {}]   ;;  %s378_s3 = inlined_call_operand.vmem [shape: f32[8,1], index: 3, kind: input, shape index: {}]   ;;  %s379_s4 = inlined_call_operand.hbm [shape: f32[8,32], index: 4, kind: output, shape index: {}]  }
   0x1   :  { %v21_v0 = vld [vmem:[%s375_s0 + $0x6] sm:$0x3]  ;;  %v20_v1 = vld [vmem:[%s375_s0 + $0x4] sm:$0x3]  ;;  %v18_v2 = vld [vmem:[%s375_s0] sm:$0x3]  ;;  %256 = vset.pattern.permute.xlu1 %v296_v3  ;;  %257 = vset.pattern.permute.xlu2 %v296_v3 }
   0x2   :  { %36 = vrot.lane.b32.xlu0 %v21_v0, %s295_s19  ;;  %34 = vrot.lane.b32.xlu1 %v20_v1, %s295_s19  ;;  %v265_v4 = vld [vmem:[%s376_s1 + $0x3] ss:$0 sm:$0xff] }
   0x3   :  { %30 = vrot.lane.b32.xlu2 %v18_v2, %s295_s19  ;;  %258 = vset.pattern.permute.xlu0 %v296_v3 }
   0x4   :  { %9 = vsyncpa [#allocation3], 0  ;;  %v19_v5 = vld [vmem:[%s375_s0 + $0x2] sm:$0x3]  ;;  %v266_v6 = vld [vmem:[%s376_s1 + $0x1] ss:$0 sm:$0xff] }
   0x5   :  { %v267_v7 = vld [vmem:[%s376_s1 + $0x2] ss:$0 sm:$0xff]  ;;  %v268_v8 = vld [vmem:[%s376_s1] ss:$0 sm:$0xff]  ;;  %v297_v9 = vmov 2   ;;  %v298_v10 = vmov 0  }
   0x6   :  { %vm42_vm0 = vcmask 7168   ;;  %vm47_vm1 = vcmask 138240   ;;  %s299_s0 = smov 127   ;;  %s300_s1 = smov 126   ;;  %v192_v39 = vld [vmem:[%s378_s3] sm:$0xff]  ;;  %vm165_vm2 = vcmask 1047556  }
   0x7   :  { %v301_v51 = vmov 1983009808   ;;  %v302_v3 = vmov 1934713408   ;;  %s303_s3 = smov 16   ;;  %vm189_vm3 = vcmask 130048  }
   0x8   :  { %v168_v52 = vunpack.c.l.s4 %v301_v51  ;;  %vm202_vm4 = vcmask 1043456   ;;  %vm198_vm5 = vcmask 31744   ;;  %s304_s10 = smov [#allocation2]   ;;  %s235_s14 = sshll.u32 %s379_s4, 4  ;;  %vm226_vm6 = vcmask 261120   ;;  %s236_s14 = int_to_ptr.hbm [resolvable:$true] %s235_s14 }
   0x9   :  { %s233_s11 = sshll.u32 %s304_s10, 4  ;;  %s234_s11 = int_to_ptr.vmem [resolvable:$true] %s233_s11 }
   0xa   :  { %97 = vperm.xlu1 %256, %v265_v4   ;;  %32 = vrot.lane.b32.xlu0 %v19_v5, %s295_s19  ;;  %v169_v59 = vunpack.c.0.s8 %v168_v52 }
   0xb   :  { %89 = vperm.xlu2 %257, %v266_v6  }
  0x12   :  { %259 = vset.pattern.permute.xlu1 %v297_v9  ;;  %93 = vperm.xlu0 %258, %v267_v7  }
  0x13   :  { %85 = vperm.xlu2 %257, %v268_v8   ;;  %137 = vperm.xlu1 %259, %v265_v4  }
  0x1a   :  { %261 = vset.pattern.permute.xlu0 %v297_v9 }
  0x1b   :  { %260 = vset.pattern.permute.xlu2 %v297_v9  ;;  %129 = vperm.xlu1 %259, %v266_v6  }
  0x1c   :  { %125 = vperm.xlu0 %261, %v268_v8   ;;  %133 = vperm.xlu2 %260, %v267_v7  }
  0x23   :  { %262 = vset.pattern.permute.xlu1 %v298_v10 }
  0x24   :  { %264 = vset.pattern.permute.xlu0 %v298_v10  ;;  %263 = vset.pattern.permute.xlu2 %v298_v10 }
  0x25   :  { %73 = vperm.xlu1 %262, %v265_v4   ;;  %61 = vperm.xlu0 %264, %v268_v8   ;;  %v180_v4 = vunpack.c.l.s4 %v302_v3 }
  0x26   :  { %65 = vperm.xlu2 %263, %v266_v6  }
  0x2d   :  { %69 = vperm.xlu1 %262, %v267_v7  }
  0x5d   :  { %v31_v11 = vpop.permute.xlu2 %30 }
  0x5e   :  { %v43_v30 = vsel %vm42_vm0, 0.0, %v31_v11  ;;  %v181_v11 = vunpack.c.0.s8 %v180_v4 }
  0x5f   :  { %v48_v31 = vsel %vm47_vm1, %v43_v30, 0.0 }
  0x65   :  { %v90_v14 = vpop.permute.xlu2 %89 }
  0x6d   :  { %v86_v24 = vpop.permute.xlu2 %85 }
  0x6e   :  { %v100_v33 = vmul.f32 %v86_v24, %v48_v31 }
  0x74   :  { %v37_v12 = vpop.permute.xlu0 %36  ;;  %v35_v13 = vpop.permute.xlu1 %34 }
  0x75   :  { %v46_v15 = vsel %vm42_vm0, 0.0, %v37_v12  ;;  %v45_v23 = vsel %vm42_vm0, 0.0, %v35_v13 }
  0x76   :  { %v51_v16 = vsel %vm47_vm1, %v46_v15, 0.0  ;;  %v50_v25 = vsel %vm47_vm1, %v45_v23, 0.0  ;;  %v134_v32 = vpop.permute.xlu2 %133 }
  0x77   :  { %v142_v36 = vmul.f32 %v134_v32, %v50_v25 }
  0x7c   :  { %v98_v17 = vpop.permute.xlu1 %97  ;;  %v33_v18 = vpop.permute.xlu0 %32 }
  0x7d   :  { %v103_v19 = vmul.f32 %v98_v17, %v51_v16  ;;  %v44_v20 = vsel %vm42_vm0, 0.0, %v33_v18  ;;  %v191_v18 = vld [vmem:[%s377_s2] sm:$0xff] }
  0x7e   :  { %v49_v21 = vsel %vm47_vm1, %v44_v20, 0.0 }
  0x7f   :  { %v101_v22 = vmul.f32 %v90_v14, %v49_v21  ;;  %114 = vrot.lane.b32.xlu2 %v103_v19, %s299_s0 }
  0x80   :  { %v66_v40 = vpop.permute.xlu2 %65 }
  0x81   :  { %110 = vrot.lane.b32.xlu1 %v101_v22, %s299_s0  ;;  %v77_v53 = vmul.f32 %v66_v40, %v49_v21 }
  0x84   :  { %v94_v26 = vpop.permute.xlu0 %93 }
  0x85   :  { %v102_v27 = vmul.f32 %v94_v26, %v50_v25  ;;  %v138_v28 = vpop.permute.xlu1 %137 }
  0x86   :  { %v143_v29 = vmul.f32 %v138_v28, %v51_v16 }
  0x87   :  { %112 = vrot.lane.b32.xlu2 %v102_v27, %s299_s0 }
  0x89   :  { %154 = vrot.lane.b32.xlu1 %v143_v29, %s300_s1 }
  0x8d   :  { %v130_v34 = vpop.permute.xlu1 %129 }
  0x8e   :  { %v141_v35 = vmul.f32 %v130_v34, %v49_v21  ;;  %v126_v37 = vpop.permute.xlu0 %125 }
  0x8f   :  { %108 = vrot.lane.b32.xlu2 %v100_v33, %s299_s0  ;;  %v140_v38 = vmul.f32 %v126_v37, %v48_v31 }
  0x90   :  { %150 = vrot.lane.b32.xlu0 %v141_v35, %s300_s1 }
  0x91   :  { %152 = vrot.lane.b32.xlu1 %v142_v36, %s300_s1 }
  0x97   :  { %148 = vrot.lane.b32.xlu2 %v140_v38, %s300_s1  ;;  %v74_v41 = vpop.permute.xlu1 %73  ;;  %v62_v47 = vpop.permute.xlu0 %61 }
  0x98   :  { %v79_v48 = vmul.f32 %v74_v41, %v51_v16  ;;  %v76_v57 = vmul.f32 %v62_v47, %v48_v31 }
  0x99   :  { %195 = vperm.xlu1 %262, %v192_v39  }
  0x9f   :  { %v70_v43 = vpop.permute.xlu1 %69 }
  0xa0   :  { %v78_v55 = vmul.f32 %v70_v43, %v50_v25 }
  0xd9   :  { %v115_v42 = vpop.permute.xlu2 %114 }
  0xda   :  { %v123_v50 = vadd.f32 %v115_v42, %v79_v48 }
  0xe1   :  { %v113_v44 = vpop.permute.xlu2 %112 }
  0xe2   :  { %v122_v58 = vadd.f32 %v113_v44, %v78_v55 }
  0xe9   :  { %v109_v46 = vpop.permute.xlu2 %108 }
  0xea   :  { %v120_v1 = vadd.f32 %v109_v46, %v76_v57 }
  0xf1   :  { %v149_v61 = vpop.permute.xlu2 %148 }
  0xf2   :  { %v160_v6 = vadd.f32 %v149_v61, %v120_v1 }
  0xf3   :  { %v111_v45 = vpop.permute.xlu1 %110 }
  0xf4   :  { %v121_v56 = vadd.f32 %v111_v45, %v77_v53 }
  0xfb   :  { %v155_v49 = vpop.permute.xlu1 %154 }
  0xfc   :  { %v163_v54 = vadd.f32 %v155_v49, %v123_v50 }
  0xfe   :  { %v171_v62 = vrot.slane %v163_v54, 4 }
 0x102   :  { %v151_v60 = vpop.permute.xlu0 %150 }
 0x103   :  { %v161_v63 = vadd.f32 %v151_v60, %v121_v56  ;;  %v153_v0 = vpop.permute.xlu1 %152 }
 0x104   :  { %v162_v2 = vadd.f32 %v153_v0, %v122_v58 }
 0x105   :  { %v172_v5 = vsel %vm165_vm2, %v171_v62, %v161_v63 }
 0x106   :  { %v176_v7 = vperm.slane %v172_v5, %v169_v59  ;;  %v164_v8 = vrot.slane %v162_v2, 4 }
 0x108   :  { %v177_v9 = vrot.slane %v176_v7, 4  ;;  %v166_v10 = vsel %vm165_vm2, %v164_v8, %v160_v6 }
 0x109   :  { %v170_v12 = vperm.slane %v166_v10, %v169_v59 }
 0x10b   :  { %v178_v13 = vsel %vm165_vm2, %v177_v9, %v170_v12  ;;  %v196_v20 = vpop.permute.xlu1 %195 }
 0x10c   :  { %v182_v14 = vperm.slane %v178_v13, %v181_v11 }
 0x10e   :  { %v183_v15 = vrot.slane %v182_v14, 4 }
 0x110   :  { %v184_v16 = vsel %vm165_vm2, 0.0, %v183_v15 }
 0x111   :  { %186 = vrot.lane.b32.xlu0 %v184_v16, %s303_s3 }
 0x183   :  { %v187_v17 = vpop.permute.xlu0 %186 }
 0x184   :  { %v190_v19 = vsel %vm189_vm3, %v182_v14, %v187_v17 }
 0x185   :  { %244 = vmatpush.msk.msra.mxu0 %vm202_vm4, %v190_v19 }
 0x186   :  { %245 = vmatmul.msk.f32.vlgmr.msra.gmra.mxu0 %vm198_vm5, %v191_v18 }
 0x203   :  { %v223_v21 = vpop.f32.mrf.mxu0 }
 0x204   :  { %v224_v22 = vadd.f32 %v223_v21, %v196_v20 }
 0x206   :  { %227 = vst.msk [vmem:[#allocation2] sm:$0xff] %vm226_vm6, %v224_v22 }
 0x207   :  { %238 = dma.vmem_to_hbm [thread:$0]  %s234_s11, 128, %s236_s14, [#allocation3]  }
 0x208   :  { %293 = dma.done.wait [#allocation3], 128  }
 0x209   :  { %294 = vsyncadd [#allocation3], 4294967168 }
 0x20a   :  { %243 = vsyncpa [#allocation3], 1 }

</bundles_post_ra>
